<compile_context>
chip_gen: v7x
topology: tpu7x:2x2x1
jax: 0.10.0
libtpu: 0.0.40
codegen_flags: <defaults>
</compile_context>

<pallas_src>
import jax
import jax.numpy as jnp
from jax.experimental import pallas as pl
from jax.experimental.pallas import tpu as pltpu


def _minus_sigmoid_kernel(x_ref, y_ref, o_ref):
    # out = x * (1 - sigmoid(y)) == x * sigmoid(-y) == x / (1 + exp(y)).
    # exp -> EUP slot; add/div/mul -> VPU. Compute stays in the input dtype
    # (bf16 VPU/EUP exist on v6e/v7x; Mosaic upconverts where needed on v5e).
    y = y_ref[...]
    one_minus_sig = 1.0 / (1.0 + jnp.exp(y))
    o_ref[...] = (x_ref[...] * one_minus_sig).astype(o_ref.dtype)


def _round_up(v, m):
    return -(-v // m) * m


def _minus_sigmoid_2d(xf, yf, block_bytes):
    """Run the elementwise kernel over a lane-dense (rows, L) slab (L % 128 == 0)."""
    rows, L = xf.shape
    dtype = xf.dtype
    itemsize = jnp.dtype(dtype).itemsize

    # Sublane granularity so packed rows stay dense: 8 (f32), 16 (bf16/f16), 32 (8-bit).
    sub = max(8, 32 // itemsize)

    if rows < 2 * sub:
        # Tiny input: one full-extent block (full-dim block shapes are exempt
        # from the 8-row divisibility rule).
        tr = rows
    else:
        # Target ~block_bytes per input per block, but always emit >= 2 grid
        # blocks so the "parallel" row axis can shard across v7x's two TCs.
        tr_budget = max(sub, (block_bytes // (L * itemsize)) // sub * sub)
        tr_half = _round_up(-(-rows // 2), sub)
        tr = min(tr_budget, tr_half)
    n_blocks = pl.cdiv(rows, tr)

    n = rows * L
    return pl.pallas_call(
        _minus_sigmoid_kernel,
        out_shape=jax.ShapeDtypeStruct((rows, L), dtype),
        grid_spec=pltpu.PrefetchScalarGridSpec(
            num_scalar_prefetch=0,
            grid=(n_blocks,),
            in_specs=[
                pl.BlockSpec((tr, L), lambda i: (i, 0)),
                pl.BlockSpec((tr, L), lambda i: (i, 0)),
            ],
            out_specs=pl.BlockSpec((tr, L), lambda i: (i, 0)),
        ),
        compiler_params=pltpu.CompilerParams(
            # Row axis is independent -> megacore sharding on v7x.
            dimension_semantics=("parallel",),
            # 3 arrays x 2 buffers x ~2 MiB ~= 12 MiB; safe on v5e/v6e/v7x.
            vmem_limit_bytes=32 * 1024 * 1024,
        ),
        cost_estimate=pl.CostEstimate(
            flops=3 * n, transcendentals=n, bytes_accessed=3 * n * itemsize
        ),
    )(xf, yf)


def minus_sigmoid(x, y, *, block_bytes=2 * 1024 * 1024):
    """out = x * (1 - sigmoid(y)); x, y same shape & float dtype, any rank."""
    assert x.shape == y.shape, "x and y must have the same shape"
    assert x.dtype == y.dtype, "x and y must have the same dtype"
    assert jnp.issubdtype(x.dtype, jnp.floating), "inputs must be floating point"
    orig_shape = x.shape
    total = x.size

    # Lane width: largest multiple of 128 that divides the element count, so the
    # (rows, L) reshape is a free bitcast (no input pad, no output slice).
    L = next((c for c in (1024, 512, 256, 128) if total % c == 0), None)

    if L is not None:
        rows = total // L
        out2 = _minus_sigmoid_2d(x.reshape(rows, L), y.reshape(rows, L), block_bytes)
        return out2.reshape(orig_shape)

    # Ragged fallback (total % 128 != 0): pad the flat arrays to the next
    # multiple of 128 and slice the result. Extra copy, but only for odd sizes.
    L = 128
    padded = pl.cdiv(total, L) * L
    pad = padded - total
    xf = jnp.pad(x.reshape(-1), (0, pad)).reshape(-1, L)
    yf = jnp.pad(y.reshape(-1), (0, pad)).reshape(-1, L)
    out2 = _minus_sigmoid_2d(xf, yf, block_bytes)
    return out2.reshape(-1)[:total].reshape(orig_shape)


if __name__ == "__main__":
    key = jax.random.PRNGKey(0)
    kx, ky = jax.random.split(key)

    # Main check: module-like NCHW activations (zero-copy path).
    B, C, H, W = 2, 4, 16, 16
    x = jax.random.normal(kx, (B, C, H, W), dtype=jnp.float32)
    y = jax.random.normal(ky, (B, C, H, W), dtype=jnp.float32)

    out = minus_sigmoid(x, y)
    jax.block_until_ready(out)

    ref = x * (1.0 - jax.nn.sigmoid(y))
    assert out.shape == ref.shape and out.dtype == ref.dtype
    assert jnp.allclose(out, ref, atol=1e-6, rtol=1e-5)

    # Secondary check: ragged size (fallback path).
    xr = jax.random.normal(kx, (3, 5, 7), dtype=jnp.float32)
    yr = jax.random.normal(ky, (3, 5, 7), dtype=jnp.float32)
    outr = minus_sigmoid(xr, yr)
    jax.block_until_ready(outr)
    refr = xr * (1.0 - jax.nn.sigmoid(yr))
    assert outr.shape == refr.shape and outr.dtype == refr.dtype
    assert jnp.allclose(outr, refr, atol=1e-6, rtol=1e-5)

    print("KERNEL_OK")
</pallas_src>

<mosaic_0001>
module attributes {stable_mosaic.version = 11 : i64} {
  func.func @_minus_sigmoid_kernel(%arg0: i32, %arg1: memref<2x1024xf32, #tpu.memory_space<vmem>>, %arg2: memref<2x1024xf32, #tpu.memory_space<vmem>>, %arg3: memref<2x1024xf32, #tpu.memory_space<vmem>>) attributes {dimension_semantics = [#tpu.dimension_semantics<parallel>], iteration_bounds = array<i64: 1>, scalar_prefetch = 0 : i64, scratch_operands = 0 : i64, tpu.core_type = #tpu.core_type<tc>, window_params = [{transform_indices = @transform_0, window_bounds = array<i64: 2, 1024>}, {transform_indices = @transform_1, window_bounds = array<i64: 2, 1024>}, {transform_indices = @transform_2, window_bounds = array<i64: 2, 1024>}]} {
    %c0 = arith.constant 0 : index
    %c0_0 = arith.constant 0 : index
    %0 = vector.load %arg2[%c0, %c0_0] : memref<2x1024xf32, #tpu.memory_space<vmem>>, vector<2x1024xf32>
    %1 = math.exp %0 : vector<2x1024xf32>
    %cst = arith.constant 1.000000e+00 : f32
    %2 = vector.broadcast %cst : f32 to vector<2x1024xf32>
    %3 = arith.addf %2, %1 : vector<2x1024xf32>
    %cst_1 = arith.constant 1.000000e+00 : f32
    %4 = vector.broadcast %cst_1 : f32 to vector<2x1024xf32>
    %5 = arith.divf %4, %3 : vector<2x1024xf32>
    %c0_2 = arith.constant 0 : index
    %c0_3 = arith.constant 0 : index
    %6 = vector.load %arg1[%c0_2, %c0_3] : memref<2x1024xf32, #tpu.memory_space<vmem>>, vector<2x1024xf32>
    %7 = arith.mulf %6, %5 : vector<2x1024xf32>
    %c0_4 = arith.constant 0 : index
    %c0_5 = arith.constant 0 : index
    %8 = vector.load %arg3[%c0_4, %c0_5] : memref<2x1024xf32, #tpu.memory_space<vmem>>, vector<2x1024xf32>
    tpu.vector_store %arg3[%c0_4, %c0_5], %7 {strides = array<i32>} : memref<2x1024xf32, #tpu.memory_space<vmem>>, vector<2x1024xf32>,
    return
  }
  func.func @transform_0(%arg0: i32) -> (i32, i32) {
    %c0_i32 = arith.constant 0 : i32
    %c0_i32_0 = arith.constant 0 : i32
    return %arg0, %c0_i32 : i32, i32
  }
  func.func @transform_1(%arg0: i32) -> (i32, i32) {
    %c0_i32 = arith.constant 0 : i32
    %c0_i32_0 = arith.constant 0 : i32
    return %arg0, %c0_i32 : i32, i32
  }
  func.func @transform_2(%arg0: i32) -> (i32, i32) {
    %c0_i32 = arith.constant 0 : i32
    %c0_i32_0 = arith.constant 0 : i32
    return %arg0, %c0_i32 : i32, i32
  }
}

</mosaic_0001>

<bundles_post_ra>
// kernel: tpu_custom_call.1
= control target key start
LH: loop header
LB: loop body
LE: loop exit
PB: predicated region body
PF: predicated region fallthrough
CT: control target
= control target key end

     0   :  { %7 = vsyncpa [#allocation3], 0  ;;  %s207_s0 = inlined_call_operand.hbm [shape: f32[2,1024], index: 0, kind: input, shape index: {}]   ;;  %s208_s1 = inlined_call_operand.hbm [shape: f32[2,1024], index: 1, kind: input, shape index: {}]   ;;  %s209_s2 = inlined_call_operand.hbm [shape: f32[2,1024], index: 2, kind: output, shape index: {}]  }
   0x1   :  { %8 = vsyncpa [#allocation6], 0 }
   0x2   :  { %9 = vsyncpa [#allocation4], 0  ;;  %s153_s9 = smov [#allocation2]   ;;  %s154_s11 = smov [#allocation5]  }
   0x3   :  { %s16_s10 = sshll.u32 %s153_s9, 4  ;;  %s26_s12 = sshll.u32 %s154_s11, 4  ;;  %s17_s10 = int_to_ptr.vmem [resolvable:$true] %s16_s10  ;;  %s27_s12 = int_to_ptr.vmem [resolvable:$true] %s26_s12 }
   0x4   :  { %s81_s15 = scalar_lea.hbm %s207_s0, 256 }
   0x5   :  { %p82_p0 = scmp.ne.s32.totalorder %s207_s0, %s81_s15  ;;  %p85_p1 = scmp.lt.u32.totalorder %s81_s15, %s207_s0 }
   0x7   :  { %p87_p2 = pnand %p85_p1, %p82_p0 }
   0x9   :  { %90 = shalt.err (!%p87_p2)
}
   0xa   :  { %s91_s20 = scalar_lea.vmem %s17_s10, 256  ;;  %p96_p4 = scmp.lt.s32.totalorder %s17_s10, %s17_s10 }
   0xb   :  { %p92_p3 = scmp.ne.s32.totalorder %s17_s10, %s91_s20  ;;  %p97_p5 = scmp.lt.s32.totalorder %s91_s20, %s91_s20 }
   0xd   :  { %p98_p6 = por %p97_p5, %p96_p4 }
   0xf   :  { %p99_p7 = pnand %p98_p6, %p92_p3 }
  0x11   :  { %102 = shalt.err (!%p99_p7)
}
  0x12   :  { %19 = dma.hbm_to_vmem [thread:$0]  %s207_s0, 256, %s17_s10, [#allocation3]  }
  0x13   :  { %s103_s25 = scalar_lea.hbm %s208_s1, 256 }
  0x14   :  { %p104_p8 = scmp.ne.s32.totalorder %s208_s1, %s103_s25  ;;  %p107_p9 = scmp.lt.u32.totalorder %s103_s25, %s208_s1 }
  0x16   :  { %p109_p10 = pnand %p107_p9, %p104_p8 }
  0x18   :  { %112 = shalt.err (!%p109_p10)
}
  0x19   :  { %s113_s30 = scalar_lea.vmem %s27_s12, 256  ;;  %p118_p12 = scmp.lt.s32.totalorder %s27_s12, %s27_s12 }
  0x1a   :  { %p114_p11 = scmp.ne.s32.totalorder %s27_s12, %s113_s30  ;;  %p119_p13 = scmp.lt.s32.totalorder %s113_s30, %s113_s30 }
  0x1c   :  { %p120_p0 = por %p119_p13, %p118_p12 }
  0x1e   :  { %p121_p1 = pnand %p120_p0, %p114_p11 }
  0x20   :  { %124 = shalt.err (!%p121_p1)
}
  0x21   :  { %29 = dma.hbm_to_vmem [thread:$0]  %s208_s1, 256, %s27_s12, [#allocation6]  }
  0x22   :  { %147 = dma.done.wait [#allocation3], 256  }
  0x23   :  { %148 = vsyncadd [#allocation3], 4294967040 }
  0x24   :  { %149 = dma.done.wait [#allocation6], 256  }
  0x25   :  { %150 = vsyncadd [#allocation6], 4294967040  ;;  %v36_v0 = vld [vmem:[#allocation5] sm:$0xff]  ;;  %v37_v1 = vld [vmem:[#allocation5 + $0x8] sm:$0xff]  ;;  %s155_s4 = smov [#allocation7]  }
  0x26   :  { %v38_v2 = vmul.f32 1.442695, %v36_v0  ;;  %v40_v3 = vmul.f32 1.442695, %v37_v1  ;;  %v48_v8 = vld [vmem:[#allocation2] sm:$0xff]  ;;  %v49_v9 = vld [vmem:[#allocation2 + $0x8] sm:$0xff] }
  0x27   :  { %s60_s1 = sshll.u32 %s155_s4, 4  ;;  %s61_s1 = int_to_ptr.vmem [resolvable:$true] %s60_s1 }
  0x28   :  { %73 = vpow2.f32 %v38_v2  ;;  %s125_s5 = scalar_lea.vmem %s61_s1, 256  ;;  %p130_p3 = scmp.lt.s32.totalorder %s61_s1, %s61_s1 }
  0x29   :  { %75 = vpow2.f32 %v40_v3  ;;  %p126_p2 = scmp.ne.s32.totalorder %s61_s1, %s125_s5  ;;  %p131_p4 = scmp.lt.s32.totalorder %s125_s5, %s125_s5 }
  0x2b   :  { %p132_p5 = por %p131_p4, %p130_p3 }
  0x2d   :  { %p133_p6 = pnand %p132_p5, %p126_p2 }
  0x32   :  { %v74_v4 = vpop.eup %73 }
  0x33   :  { %v76_v5 = vpop.eup %75  ;;  %v42_v6 = vadd.f32 1.0, %v74_v4 }
  0x34   :  { %v43_v7 = vadd.f32 1.0, %v76_v5 }
  0x35   :  { %77 = vrcp.f32 %v42_v6 }
  0x36   :  { %79 = vrcp.f32 %v43_v7 }
  0x3f   :  { %v78_v10 = vpop.eup %77 }
  0x40   :  { %v80_v11 = vpop.eup %79  ;;  %v50_v12 = vmul.f32 %v78_v10, %v48_v8 }
  0x41   :  { %v51_v13 = vmul.f32 %v80_v11, %v49_v9 }
  0x42   :  { %52 = vst [vmem:[#allocation7] sm:$0xff] %v50_v12 }
  0x43   :  { %53 = vst [vmem:[#allocation7 + $0x8] sm:$0xff] %v51_v13 }
  0x44   :  { %136 = shalt.err (!%p133_p6)
}
  0x45   :  { %s137_s8 = scalar_lea.hbm %s209_s2, 256 }
  0x46   :  { %p138_p7 = scmp.ne.s32.totalorder %s209_s2, %s137_s8  ;;  %p141_p8 = scmp.lt.u32.totalorder %s137_s8, %s209_s2 }
  0x48   :  { %p143_p9 = pnand %p141_p8, %p138_p7 }
  0x4a   :  { %146 = shalt.err (!%p143_p9)
}
  0x4b   :  { %63 = dma.vmem_to_hbm [thread:$0]  %s61_s1, 256, %s209_s2, [#allocation4]  }
  0x4c   :  { %151 = dma.done.wait [#allocation4], 256  }
  0x4d   :  { %152 = vsyncadd [#allocation4], 4294967040 }
  0x4e   :  { %67 = vsyncpa [#allocation3], 1 }
  0x4f   :  { %68 = vsyncpa [#allocation6], 1 }
  0x50   :  { %69 = vsyncpa [#allocation4], 1 }

</bundles_post_ra>
